<compile_context>
chip_gen: v7x
topology: tpu7x:2x2x1
jax: 0.10.0
libtpu: 0.0.40
codegen_flags: <defaults>
</compile_context>

<pallas_src>
import functools

import jax
import jax.numpy as jnp
from jax import lax
from jax.experimental import pallas as pl
from jax.experimental.pallas import tpu as pltpu

ALPHA = 0.5
LAMDA = 0.05


def _round_up(x, m):
    return (x + m - 1) // m * m


def _cdiv(a, b):
    return -(-a // b)


def _anchor_loss_kernel(x_ref, tgt_ref, partial_ref, *, alpha, lamda, b, nl,
                        nl_pad, tb, steps, binary_target,
                        need_row_mask, need_col_mask):
    c = pl.program_id(0)          # megacore split axis ("parallel")
    i = pl.program_id(1)          # row-tile stream within this core ("arbitrary")

    @pl.when(i == 0)
    def _init():
        partial_ref[...] = jnp.zeros_like(partial_ref)

    x = x_ref[...].astype(jnp.float32)            # [TB, 2*NL_pad]
    x_pos = x[:, :nl_pad]                         # lane-aligned slice: free
    x_neg = x[:, nl_pad:]
    t = tgt_ref[...].astype(jnp.float32)          # [TB, NL_pad]

    def sigmoid_terms(v):
        # log(sigmoid(v)) = min(v,0) - log(1+exp(-|v|))   (stable, finite)
        # sigmoid(v) reuses the same exp: 1 exp + 1 log + 1 vrcp per element.
        e = jnp.exp(-jnp.abs(v))
        one_plus_e = 1.0 + e
        log_sig = jnp.minimum(v, 0.0) - jnp.log(one_plus_e)
        s = pl.reciprocal(one_plus_e, approx=True)
        p = jnp.where(v >= 0.0, s, 1.0 - s)
        return log_sig, log_sig - v, p            # log p, log(1-p), p

    log_p_pos, log_1m_pos, p_pos = sigmoid_terms(x_pos)
    log_p_neg, log_1m_neg, p_neg = sigmoid_terms(x_neg)

    if alpha == 0.5:                              # static specialization
        powf = jnp.sqrt
    elif alpha == 1.0:
        powf = lambda v: v
    else:
        # Generic alpha costs 2 extra EUP ops per element (exp + log).
        powf = lambda v: jnp.exp(jnp.float32(alpha) * jnp.log(v))

    if binary_target:
        # Valid only for hard 0/1 labels: one pow per element + selects.
        t1 = t > 0.5
        thresh = jnp.where(t1, p_pos, p_neg) - jnp.float32(lamda)
        arg = (1.0 - thresh) + jnp.where(t1, p_neg, p_pos)
        total = -(jnp.where(t1, log_p_pos, log_p_neg)
                  + powf(arg) * jnp.where(t1, log_1m_neg, log_1m_pos))
    else:
        inv_t = 1.0 - t
        thresh = t * p_pos + inv_t * p_neg - jnp.float32(lamda)
        total = (-(t * log_p_pos)
                 - (inv_t * powf(1.0 + p_pos - thresh) * log_1m_pos)
                 - (inv_t * log_p_neg)
                 - (t * powf(1.0 + p_neg - thresh) * log_1m_neg))

    if need_row_mask or need_col_mask:
        mask = None
        if need_row_mask:
            tile = c * steps + i                  # logical (unclamped) tile index
            row = tile * tb + lax.broadcasted_iota(jnp.int32, total.shape, 0)
            mask = row < b
        if need_col_mask:
            col = lax.broadcasted_iota(jnp.int32, total.shape, 1)
            cm = col < nl
            mask = cm if mask is None else jnp.logical_and(mask, cm)
        total = jnp.where(mask, total, 0.0)       # select: garbage/NaN never leaks

    # VALU-only cross-vreg partial reduction into the resident output block.
    partial_ref[...] += jnp.sum(total.reshape(tb // 8, 8, nl_pad), axis=0)


@functools.partial(jax.jit, static_argnames=("alpha", "lamda", "binary_target"))
def multilabel_anchor_loss(output, target, alpha=ALPHA, lamda=LAMDA,
                           binary_target=False):
    b, two_nl = output.shape
    bt, nl = target.shape
    assert b == bt and two_nl == 2 * nl, "output must be [B, 2*N_LABELS]"

    nl_pad = _round_up(max(nl, 128), 128)
    need_col_mask = (nl_pad != nl)

    if need_col_mask:
        # Column padding is the only wrapper-side copy (so the pos/neg split
        # point is lane-aligned). Ragged B is handled in-kernel.
        out_p = jnp.pad(output.reshape(b, 2, nl),
                        ((0, 0), (0, 0), (0, nl_pad - nl))).reshape(b, 2 * nl_pad)
        tgt_p = jnp.pad(target, ((0, 0), (0, nl_pad - nl)))
    else:
        out_p, tgt_p = output, target

    # Sublane alignment of the row tile (8 for f32, 16 for bf16, 32 for int8).
    min_itemsize = min(out_p.dtype.itemsize, tgt_p.dtype.itemsize)
    sublane = max(8, 32 // min_itemsize)

    b_rows = b
    if b_rows < sublane:
        out_p = jnp.pad(out_p, ((0, sublane - b_rows), (0, 0)))
        tgt_p = jnp.pad(tgt_p, ((0, sublane - b_rows), (0, 0)))
        b_rows = sublane

    # Row tile: <= ~8 MiB of live block bytes per grid step (double-buffered
    # ~16 MiB), safely under v7x's 64 MiB physical VMEM / 48 MiB scoped limit.
    row_bytes = 2 * nl_pad * out_p.dtype.itemsize + nl_pad * tgt_p.dtype.itemsize
    tb = min(4096,
             max(sublane, ((8 << 20) // row_bytes) // sublane * sublane),
             (b_rows // sublane) * sublane,
             _round_up(_cdiv(b_rows, 2), sublane))
    tb = max(sublane, (tb // sublane) * sublane)

    nt = _cdiv(b_rows, tb)             # total row tiles
    steps = _cdiv(nt, 2)               # row tiles per (mega)core
    need_row_mask = (2 * steps * tb != b)

    kernel = functools.partial(
        _anchor_loss_kernel,
        alpha=float(alpha), lamda=float(lamda), b=b, nl=nl, nl_pad=nl_pad,
        tb=tb, steps=steps, binary_target=bool(binary_target),
        need_row_mask=need_row_mask, need_col_mask=need_col_mask)

    def row_block(c, i):
        # Clamp so boundary/duplicate tiles never DMA fully out of bounds;
        # the in-kernel row mask zeroes any duplicated / padded rows.
        return (jnp.minimum(c * steps + i, nt - 1), 0)

    n_trans = 6 if (binary_target and float(alpha) in (0.5, 1.0)) else 8
    partials = pl.pallas_call(
        kernel,
        out_shape=jax.ShapeDtypeStruct((16, nl_pad), jnp.float32),
        grid_spec=pltpu.PrefetchScalarGridSpec(
            num_scalar_prefetch=0,
            grid=(2, steps),
            in_specs=[
                pl.BlockSpec((tb, 2 * nl_pad), row_block),   # one contiguous DMA
                pl.BlockSpec((tb, nl_pad), row_block),
            ],
            out_specs=pl.BlockSpec((8, nl_pad), lambda c, i: (c, 0)),
        ),
        compiler_params=pltpu.CompilerParams(
            dimension_semantics=("parallel", "arbitrary"),
            vmem_limit_bytes=48 << 20,
        ),
        cost_estimate=pl.CostEstimate(
            flops=int(30 * b * nl),
            transcendentals=int(n_trans * b * nl),
            bytes_accessed=int(output.size * output.dtype.itemsize
                               + target.size * target.dtype.itemsize
                               + 16 * nl_pad * 4),
        ),
    )(out_p, tgt_p)

    return jnp.sum(partials) * jnp.float32(1.0 / (b * nl))


def _reference_loss(output, target, alpha=ALPHA, lamda=LAMDA):
    # Direct transcription of the PyTorch module (naive formulation).
    nl = target.shape[1]
    out = output.astype(jnp.float32)
    tgt = target.astype(jnp.float32)
    probs = jax.nn.sigmoid(out)
    pos_probs, neg_probs = probs[:, :nl], probs[:, nl:]
    inv_target = 1.0 - tgt
    thresh = tgt * pos_probs + inv_target * neg_probs - lamda
    p1 = -(tgt * jnp.log(pos_probs))
    p2 = -(inv_target * jnp.power(1.0 + pos_probs - thresh, alpha)
           * jnp.log(1.0 - pos_probs))
    n1 = -(inv_target * jnp.log(neg_probs))
    n2 = -(tgt * jnp.power(1.0 + neg_probs - thresh, alpha)
           * jnp.log(1.0 - neg_probs))
    return jnp.mean(p1 + p2 + n1 + n2)


if __name__ == "__main__":
    key = jax.random.PRNGKey(0)

    # Case 1: lane-aligned shapes; general (soft-label-safe) path + binary path.
    B, NL = 16, 128
    k1, k2, key = jax.random.split(key, 3)
    output = jax.random.normal(k1, (B, 2 * NL), dtype=jnp.float32)
    target = jax.random.bernoulli(k2, p=0.3, shape=(B, NL)).astype(jnp.float32)

    loss = jax.block_until_ready(multilabel_anchor_loss(output, target))
    ref = _reference_loss(output, target)
    assert jnp.allclose(loss, ref, rtol=1e-3, atol=1e-3), (loss, ref)

    loss_bin = jax.block_until_ready(
        multilabel_anchor_loss(output, target, binary_target=True))
    assert jnp.allclose(loss_bin, ref, rtol=1e-3, atol=1e-3), (loss_bin, ref)

    # Case 2: unaligned / ragged shapes (column padding + row & col masks).
    B2, N2 = 10, 37
    k3, k4, key = jax.random.split(key, 3)
    output2 = jax.random.normal(k3, (B2, 2 * N2), dtype=jnp.float32)
    target2 = jax.random.bernoulli(k4, p=0.3, shape=(B2, N2)).astype(jnp.float32)

    loss2 = jax.block_until_ready(multilabel_anchor_loss(output2, target2))
    ref2 = _reference_loss(output2, target2)
    assert jnp.allclose(loss2, ref2, rtol=1e-3, atol=1e-3), (loss2, ref2)

    # Case 3: bf16 logits streamed without wrapper upcast (cast in-register).
    output3 = output.astype(jnp.bfloat16)
    loss3 = jax.block_until_ready(multilabel_anchor_loss(output3, target))
    ref3 = _reference_loss(output3.astype(jnp.float32), target)
    assert jnp.allclose(loss3, ref3, rtol=5e-3, atol=5e-3), (loss3, ref3)

    print("KERNEL_OK")
</pallas_src>

<mosaic_0001>
module attributes {stable_mosaic.version = 11 : i64} {
  func.func @_anchor_loss_kernel(%arg0: i32, %arg1: i32, %arg2: memref<8x256xf32, #tpu.memory_space<vmem>>, %arg3: memref<8x128xf32, #tpu.memory_space<vmem>>, %arg4: memref<8x128xf32, #tpu.memory_space<vmem>>) attributes {dimension_semantics = [#tpu.dimension_semantics<parallel>, #tpu.dimension_semantics<arbitrary>], iteration_bounds = array<i64: 2, 1>, scalar_prefetch = 0 : i64, scratch_operands = 0 : i64, tpu.core_type = #tpu.core_type<tc>, window_params = [{transform_indices = @transform_0, window_bounds = array<i64: 8, 256>}, {transform_indices = @transform_1, window_bounds = array<i64: 8, 128>}, {transform_indices = @transform_2, window_bounds = array<i64: 8, 128>}]} {
    %c0_i32 = arith.constant 0 : i32
    %0 = arith.cmpi eq, %arg1, %c0_i32 : i32
    %1 = arith.extui %0 : i1 to i32
    %c0_i32_0 = arith.constant 0 : i32
    %2 = arith.cmpi ne, %1, %c0_i32_0 : i32
    scf.if %2 {
      %cst_23 = arith.constant 0.000000e+00 : f32
      %72 = vector.broadcast %cst_23 : f32 to vector<8x128xf32>
      %c0_24 = arith.constant 0 : index
      %c0_25 = arith.constant 0 : index
      %73 = vector.load %arg4[%c0_24, %c0_25] : memref<8x128xf32, #tpu.memory_space<vmem>>, vector<8x128xf32>
      tpu.vector_store %arg4[%c0_24, %c0_25], %72 {strides = array<i32>} : memref<8x128xf32, #tpu.memory_space<vmem>>, vector<8x128xf32>,
    } else {
    }
    %c0 = arith.constant 0 : index
    %c0_1 = arith.constant 0 : index
    %3 = vector.load %arg2[%c0, %c0_1] : memref<8x256xf32, #tpu.memory_space<vmem>>, vector<8x256xf32>
    %4 = vector.extract_strided_slice %3 {offsets = [0, 0], sizes = [8, 128], strides = [1, 1]} : vector<8x256xf32> to vector<8x128xf32>
    %5 = vector.extract_strided_slice %3 {offsets = [0, 128], sizes = [8, 128], strides = [1, 1]} : vector<8x256xf32> to vector<8x128xf32>
    %c0_2 = arith.constant 0 : index
    %c0_3 = arith.constant 0 : index
    %6 = vector.load %arg3[%c0_2, %c0_3] : memref<8x128xf32, #tpu.memory_space<vmem>>, vector<8x128xf32>
    %7 = math.absf %4 : vector<8x128xf32>
    %cst = arith.constant 0.000000e+00 : f32
    %8 = vector.broadcast %cst : f32 to vector<8x128xf32>
    %9 = arith.subf %8, %7 : vector<8x128xf32>
    %10 = math.exp %9 : vector<8x128xf32>
    %cst_4 = arith.constant 1.000000e+00 : f32
    %11 = vector.broadcast %cst_4 : f32 to vector<8x128xf32>
    %12 = arith.addf %11, %10 : vector<8x128xf32>
    %cst_5 = arith.constant 0.000000e+00 : f32
    %13 = vector.broadcast %cst_5 : f32 to vector<8x128xf32>
    %14 = arith.minimumf %4, %13 : vector<8x128xf32>
    %15 = math.log %12 : vector<8x128xf32>
    %16 = arith.subf %14, %15 : vector<8x128xf32>
    %17 = tpu.reciprocal %12 {approx = true} : vector<8x128xf32> -> vector<8x128xf32>
    %cst_6 = arith.constant 0.000000e+00 : f32
    %18 = vector.broadcast %cst_6 : f32 to vector<8x128xf32>
    %19 = arith.cmpf oge, %4, %18 : vector<8x128xf32>
    %cst_7 = arith.constant 1.000000e+00 : f32
    %20 = vector.broadcast %cst_7 : f32 to vector<8x128xf32>
    %21 = arith.subf %20, %17 : vector<8x128xf32>
    %22 = arith.select %19, %17, %21 : vector<8x128xi1>, vector<8x128xf32>
    %23 = arith.subf %16, %4 : vector<8x128xf32>
    %24 = math.absf %5 : vector<8x128xf32>
    %cst_8 = arith.constant 0.000000e+00 : f32
    %25 = vector.broadcast %cst_8 : f32 to vector<8x128xf32>
    %26 = arith.subf %25, %24 : vector<8x128xf32>
    %27 = math.exp %26 : vector<8x128xf32>
    %cst_9 = arith.constant 1.000000e+00 : f32
    %28 = vector.broadcast %cst_9 : f32 to vector<8x128xf32>
    %29 = arith.addf %28, %27 : vector<8x128xf32>
    %cst_10 = arith.constant 0.000000e+00 : f32
    %30 = vector.broadcast %cst_10 : f32 to vector<8x128xf32>
    %31 = arith.minimumf %5, %30 : vector<8x128xf32>
    %32 = math.log %29 : vector<8x128xf32>
    %33 = arith.subf %31, %32 : vector<8x128xf32>
    %34 = tpu.reciprocal %29 {approx = true} : vector<8x128xf32> -> vector<8x128xf32>
    %cst_11 = arith.constant 0.000000e+00 : f32
    %35 = vector.broadcast %cst_11 : f32 to vector<8x128xf32>
    %36 = arith.cmpf oge, %5, %35 : vector<8x128xf32>
    %cst_12 = arith.constant 1.000000e+00 : f32
    %37 = vector.broadcast %cst_12 : f32 to vector<8x128xf32>
    %38 = arith.subf %37, %34 : vector<8x128xf32>
    %39 = arith.select %36, %34, %38 : vector<8x128xi1>, vector<8x128xf32>
    %40 = arith.subf %33, %5 : vector<8x128xf32>
    %cst_13 = arith.constant 1.000000e+00 : f32
    %41 = vector.broadcast %cst_13 : f32 to vector<8x128xf32>
    %42 = arith.subf %41, %6 : vector<8x128xf32>
    %43 = arith.mulf %6, %22 : vector<8x128xf32>
    %44 = arith.mulf %42, %39 : vector<8x128xf32>
    %45 = arith.addf %43, %44 : vector<8x128xf32>
    %cst_14 = arith.constant 5.000000e-02 : f32
    %46 = vector.broadcast %cst_14 : f32 to vector<8x128xf32>
    %47 = arith.subf %45, %46 : vector<8x128xf32>
    %48 = arith.mulf %6, %16 : vector<8x128xf32>
    %cst_15 = arith.constant 0.000000e+00 : f32
    %49 = vector.broadcast %cst_15 : f32 to vector<8x128xf32>
    %50 = arith.subf %49, %48 : vector<8x128xf32>
    %cst_16 = arith.constant 1.000000e+00 : f32
    %51 = vector.broadcast %cst_16 : f32 to vector<8x128xf32>
    %52 = arith.addf %51, %22 : vector<8x128xf32>
    %53 = arith.subf %52, %47 : vector<8x128xf32>
    %54 = math.sqrt %53 : vector<8x128xf32>
    %55 = arith.mulf %42, %54 : vector<8x128xf32>
    %56 = arith.mulf %55, %23 : vector<8x128xf32>
    %57 = arith.subf %50, %56 : vector<8x128xf32>
    %58 = arith.mulf %42, %33 : vector<8x128xf32>
    %59 = arith.subf %57, %58 : vector<8x128xf32>
    %cst_17 = arith.constant 1.000000e+00 : f32
    %60 = vector.broadcast %cst_17 : f32 to vector<8x128xf32>
    %61 = arith.addf %60, %39 : vector<8x128xf32>
    %62 = arith.subf %61, %47 : vector<8x128xf32>
    %63 = math.sqrt %62 : vector<8x128xf32>
    %64 = arith.mulf %6, %63 : vector<8x128xf32>
    %65 = arith.mulf %64, %40 : vector<8x128xf32>
    %66 = arith.subf %59, %65 : vector<8x128xf32>
    %c0_18 = arith.constant 0 : index
    %c0_19 = arith.constant 0 : index
    %67 = vector.load %arg4[%c0_18, %c0_19] : memref<8x128xf32, #tpu.memory_space<vmem>>, vector<8x128xf32>
    %68 = vector.shape_cast %66 : vector<8x128xf32> to vector<1x8x128xf32>
    %cst_20 = arith.constant dense<0.000000e+00> : vector<8x128xf32>
    %69 = vector.multi_reduction <add>, %68, %cst_20 [0] : vector<1x8x128xf32> to vector<8x128xf32>
    %70 = arith.addf %67, %69 : vector<8x128xf32>
    %c0_21 = arith.constant 0 : index
    %c0_22 = arith.constant 0 : index
    %71 = vector.load %arg4[%c0_21, %c0_22] : memref<8x128xf32, #tpu.memory_space<vmem>>, vector<8x128xf32>
    tpu.vector_store %arg4[%c0_21, %c0_22], %70 {strides = array<i32>} : memref<8x128xf32, #tpu.memory_space<vmem>>, vector<8x128xf32>,
    return
  }
  func.func @transform_0(%arg0: i32, %arg1: i32) -> (i32, i32) {
    %c1_i32 = arith.constant 1 : i32
    %0 = arith.muli %arg0, %c1_i32 : i32
    %1 = arith.addi %0, %arg1 : i32
    %c1_i32_0 = arith.constant 1 : i32
    %2 = arith.minsi %1, %c1_i32_0 : i32
    %c0_i32 = arith.constant 0 : i32
    %c0_i32_1 = arith.constant 0 : i32
    return %2, %c0_i32 : i32, i32
  }
  func.func @transform_1(%arg0: i32, %arg1: i32) -> (i32, i32) {
    %c1_i32 = arith.constant 1 : i32
    %0 = arith.muli %arg0, %c1_i32 : i32
    %1 = arith.addi %0, %arg1 : i32
    %c1_i32_0 = arith.constant 1 : i32
    %2 = arith.minsi %1, %c1_i32_0 : i32
    %c0_i32 = arith.constant 0 : i32
    %c0_i32_1 = arith.constant 0 : i32
    return %2, %c0_i32 : i32, i32
  }
  func.func @transform_2(%arg0: i32, %arg1: i32) -> (i32, i32) {
    %c0_i32 = arith.constant 0 : i32
    %c0_i32_0 = arith.constant 0 : i32
    return %arg0, %c0_i32 : i32, i32
  }
}

</mosaic_0001>

<bundles_post_ra>
// kernel: multilabel_anchor_loss.1
= control target key start
LH: loop header
LB: loop body
LE: loop exit
PB: predicated region body
PF: predicated region fallthrough
CT: control target
= control target key end

     0   :  { %7 = vsyncpa [#allocation3], 0  ;;  %s806_s0 = inlined_call_operand.hbm [shape: f32[16,256], index: 0, kind: input, shape index: {}]   ;;  %s807_s1 = inlined_call_operand.hbm [shape: f32[16,128], index: 1, kind: input, shape index: {}]   ;;  %s808_s2 = inlined_call_operand.vmem [shape: f32[16,128], index: 2, kind: output, shape index: {}]  }
   0x1   :  { %9 = vsyncpa [#allocation3 + $0x1], 0 }
   0x2   :  { %10 = vsyncpa [#allocation5], 0 }
   0x3   :  { %12 = vsyncpa [#allocation5 + $0x1], 0  ;;  %s629_s9 = smov 0   ;;  %s631_s10 = smov 0  }
   0x4   :  { %s633_s11 = smov 0   ;;  %s635_s12 = smov 0  }
   0x5   :  { %s637_s13 = smov 0   ;;  %s639_s14 = smov 0  }
   0x6 LB: > { %s402_s15 = sadd.s32 4294967295, %s610_s14   ;;  %s30_s16 = sadd.s32 1, %s606_s13  ;;  %s610_s14 = sphi %s639_s14, %s18_s14   ;;  %s606_s13 = sphi %s637_s13, %s821_s13   ;;  %s602_s12 = sphi %s635_s12, %s820_s12   ;;  %s598_s11 = sphi %s633_s11, %s819_s11   ;;  %s594_s10 = sphi %s631_s10, %s818_s10   ;;  %s590_s9 = sphi %s629_s9, %s817_s9  }
   0x7   : > { %p32_p0 = scmp.ge.s32.totalorder %s30_s16, 2  ;;  %p35_p1 = scmp.lt.s32.totalorder %s606_s13, 1 }
   0x8   : > { %s43_s17 = sadd.s32 1, %s598_s11  ;;  %p50_p2 = scmp.ne.s32.totalorder %s598_s11, %s594_s10 }
   0x9   : > { %s823_s16 = smov (%p32_p0, %s30_s16), 0  ;;  %p51_p4 = scmp.eq.s32.totalorder %s610_s14, 0 }
   0xa   : > { %s666_s18 = scalar_select %p35_p1, %s606_s13, 1 }
   0xb   : > { %p38_p3 = scmp.lt.s32.totalorder %s823_s16, 1  ;;  %p56_p5 = scmp.ne.s32.totalorder %s594_s10, %s590_s9 }
   0xc   : > { %p57_p6 = scmp.eq.s32.totalorder %s402_s15, 0  ;;  %p52_p7 = por %p51_p4, %p50_p2 }
   0xd   : > { %s39_s19 = scalar_select %p38_p3, %s823_s16, 1 }
   0xe   : > { %p672_p8 = por %p57_p6, %p56_p5  ;;  %p430_p10 = scmp.lt.s32.totalorder %s610_s14, 2 }
   0xf   : > { %s40_s21 = ssub.s32 %s666_s18, %s39_s19  ;;  %s679_s22 = sand.u32 1, %s598_s11  }
  0x10   : > { %s810_s20 = scalar_select %p672_p8, 1, 0 }
  0x11   : > { %p41_p9 = scmp.eq.s32.totalorder %s40_s21, 0  ;;  %s418_s23 = sshll.u32 %s666_s18, 8 }
  0x12   : > { %s406_s25 = sshll.u32 %s679_s22, 4  ;;  %s689_s28 = scalar_lea.hbm %s806_s0, %s418_s23 }
  0x13   : > { %s683_s24 = scalar_select %p41_p9, %s598_s11, %s43_s17  }
  0x14   : > { %s142_s29 = scalar_lea.vmem [#allocation2], %s406_s25  ;;  %p691_p11 = pnand %p430_p10, %p52_p7 }
  0x15   : > { %s153_s30 = sshll.u32 %s142_s29, 4  ;;  %s139_s4 = scalar_lea.sflag [#allocation3], %s679_s22  ;;  %s695_s30 = int_to_ptr.vmem [resolvable:$true] %s153_s30 }
  0x16   : > { %s496_s5 = scalar_lea.hbm %s689_s28, 256  ;;  %p498_p1 = pneg %p691_p11 }
  0x17   : > { %p497_p0 = scmp.ne.s32.totalorder %s689_s28, %s496_s5  ;;  %s501_s8 = scalar_lea.hbm %s806_s0, 512 }
  0x18   : > { %p502_p4 = scmp.lt.u32.totalorder %s689_s28, %s806_s0  ;;  %p503_p5 = scmp.lt.u32.totalorder %s501_s8, %s496_s5 }
  0x19   : > { %p499_p2 = pnand %p498_p1, %p497_p0  ;;  %p505_p7 = scmp.lt.u32.totalorder %s496_s5, %s689_s28 }
  0x1a   : > { %p504_p6 = por %p503_p5, %p502_p4 }
  0x1b   : > { %p500_p3 = pneg %p499_p2 }
  0x1c   : > { %p506_p9 = por %p505_p7, %p504_p6 }
  0x1e   : > { %p507_p10 = pnand %p506_p9, %p500_p3 }
  0x20   : > { %510 = shalt.err (!%p507_p10)
}
  0x21   : > { %s511_s17 = scalar_lea.vmem %s695_s30, 256  ;;  %s612_s19 = smov [#allocation2]  }
  0x22   : > { %p512_p0 = scmp.ne.s32.totalorder %s695_s30, %s511_s17  ;;  %s516_s21 = sshll.u32 %s612_s19, 4  ;;  %s517_s21 = int_to_ptr.vmem [resolvable:$false] %s516_s21 }
  0x23   : > { %s518_s23 = scalar_lea.vmem %s517_s21, 512  ;;  %p519_p13 = scmp.lt.s32.totalorder %s695_s30, %s517_s21 }
  0x24   : > { %p514_p2 = pnand %p512_p0, %p498_p1  ;;  %p520_p4 = scmp.lt.s32.totalorder %s518_s23, %s511_s17 }
  0x26   : > { %p515_p12 = pneg %p514_p2  ;;  %p521_p5 = por %p520_p4, %p519_p13 }
  0x28   : > { %p522_p6 = pnand %p521_p5, %p515_p12 }
  0x2a   : > { %525 = shalt.err (!%p522_p6)
}
  0x2b   : > { %426 = dma.hbm_to_vmem [thread:$0]  (!%p691_p11), %s689_s28, 256, %s695_s30, %s139_s4  }
  0x2c   : > { %p812_p3 = scmp.lt.s32.totalorder %s610_s14, 3  ;;  %p813_p7 = scmp.ge.s32.totalorder %s610_s14, 1 }
  0x2d   : > { %s409_s26 = sshll.u32 %s679_s22, 3  ;;  %s410_s27 = sshll.u32 %s666_s18, 7 }
  0x2e   : > { %p729_p9 = pnand %p813_p7, %p812_p3  ;;  %s738_s6 = scalar_lea.hbm %s807_s1, %s410_s27 }
  0x2f   : > { %s164_s7 = scalar_lea.vmem [#allocation4], %s409_s26  ;;  %s161_s28 = scalar_lea.sflag [#allocation5], %s679_s22 }
  0x30   : > { %s814_s25 = scalar_select %p729_p9, 1, 0 }
  0x31   : > { %s174_s8 = sshll.u32 %s164_s7, 4  ;;  %s526_s30 = scalar_lea.hbm %s738_s6, 128  ;;  %s175_s8 = int_to_ptr.vmem [resolvable:$true] %s174_s8 }
  0x32   : > { %p527_p12 = scmp.ne.s32.totalorder %s738_s6, %s526_s30  ;;  %s531_s9 = scalar_lea.hbm %s807_s1, 256 }
  0x33   : > { %p532_p0 = scmp.lt.u32.totalorder %s738_s6, %s807_s1  ;;  %p533_p2 = scmp.lt.u32.totalorder %s531_s9, %s526_s30 }
  0x34   : > { %p529_p13 = pnand %p527_p12, %p498_p1  ;;  %p535_p5 = scmp.lt.u32.totalorder %s526_s30, %s738_s6 }
  0x35   : > { %p534_p4 = por %p533_p2, %p532_p0 }
  0x36   : > { %p530_p10 = pneg %p529_p13 }
  0x37   : > { %p536_p6 = por %p535_p5, %p534_p4 }
  0x39   : > { %p537_p3 = pnand %p536_p6, %p530_p10 }
  0x3b   : > { %540 = shalt.err (!%p537_p3)
}
  0x3c   : > { %s541_s22 = scalar_lea.vmem %s175_s8, 128  ;;  %s613_s19 = smov [#allocation4]  }
  0x3d   : > { %p542_p7 = scmp.ne.s32.totalorder %s175_s8, %s541_s22  ;;  %s546_s21 = sshll.u32 %s613_s19, 4  ;;  %s547_s21 = int_to_ptr.vmem [resolvable:$false] %s546_s21 }
  0x3e   : > { %s548_s23 = scalar_lea.vmem %s547_s21, 256  ;;  %p549_p8 = scmp.lt.s32.totalorder %s175_s8, %s547_s21 }
  0x3f   : > { %p544_p12 = pnand %p542_p7, %p498_p1  ;;  %p550_p9 = scmp.lt.s32.totalorder %s548_s23, %s541_s22 }
  0x41   : > { %p545_p13 = pneg %p544_p12  ;;  %p551_p0 = por %p550_p9, %p549_p8 }
  0x43   : > { %p552_p2 = pnand %p551_p0, %p545_p13 }
  0x45   : > { %555 = shalt.err (!%p552_p2)
}
  0x46   : > { %429 = dma.hbm_to_vmem [thread:$0]  (!%p691_p11), %s738_s6, 128, %s175_s8, %s161_s28  }
  0x47   : > { %p815_p10 = scmp.ne.s32.totalorder %s814_s25, 0 }
  0x48   : > { %s185_s26 = sand.u32 (!%p815_p10), 1, %s594_s10   ;;  %p816_p1 = scmp.ne.s32.totalorder (!%p815_p10), %s810_s20, 0 }
  0x49   : > { %183 = sbr.rel (%p815_p10) target bundleno = 153 (0x99), region = 28  ;;  %s412_s27 = sshll.u32 (!%p815_p10), %s185_s26, 4 }
  0x4a   : > { %s186_s29 = scalar_lea.sflag (!%p815_p10), [#allocation3], %s185_s26  ;;  %s189_s5 = scalar_lea.vmem (!%p815_p10), [#allocation2], %s412_s27 }
  0x50   : > { %581 = dma.done.wait (%p816_p1), %s186_s29, 256  }
  0x51   : > { %583 = vsyncadd (%p816_p1), %s186_s29, 4294967040  ;;  %s413_s7 = sshll.u32 %s185_s26, 3  ;;  %s195_s30 = scalar_lea.sflag [#allocation5], %s185_s26 }
  0x52   : > { %s198_s3 = scalar_lea.vmem [#allocation4], %s413_s7 }
  0x53   : > { %585 = dma.done.wait (%p816_p1), %s195_s30, 128  }
  0x54   : > { %587 = vsyncadd (%p816_p1), %s195_s30, 4294967168  ;;  %v771_v0 = vld [vmem:[%s189_s5] sm:$0xff]  ;;  %v773_v1 = vld [vmem:[%s189_s5 + $0x8] sm:$0xff]  ;;  %p229_p8 = scmp.lt.s32.totalorder %s602_s12, 1 }
  0x55   : > { %v241_v2 = vand.u32 2147483647, %v771_v0  ;;  %v255_v3 = vand.u32 2147483647, %v773_v1  ;;  %v240_v12 = vld [vmem:[%s198_s3] sm:$0xff]  ;;  %vm251_vm0 = vcmp.ge.f32.partialorder %v771_v0, 0.0 }
  0x56   : > { %vm265_vm1 = vcmp.ge.f32.partialorder %v773_v1, 0.0  ;;  %v269_v16 = vsub.f32 1.0, %v240_v12  ;;  %v246_v29 = vmin.f32 %v771_v0, 0.0  ;;  %v260_v33 = vmin.f32 %v773_v1, 0.0  ;;  %s825_s12 = smov (!%p229_p8, %s602_s12), 1 }
  0x57   : > { %v242_v4 = vsub.f32 0.0, %v241_v2  ;;  %v256_v5 = vsub.f32 0.0, %v255_v3  ;;  %s414_s20 = sshll.u32 %s825_s12, 3 }
  0x58   : > { %s232_s8 = scalar_lea.vmem %s808_s2, %s414_s20 }
  0x59   : > { %v243_v6 = vmul.f32 1.442695, %v242_v4  ;;  %v257_v7 = vmul.f32 1.442695, %v256_v5 }
  0x5b   : > { %480 = vpow2.f32 %v243_v6 }
  0x5c   : > { %482 = vpow2.f32 %v257_v7 }
  0x65   : > { %v481_v8 = vpop.eup %480 }
  0x66   : > { %v483_v9 = vpop.eup %482  ;;  %v245_v10 = vadd.f32 1.0, %v481_v8 }
  0x67   : > { %v259_v11 = vadd.f32 1.0, %v483_v9 }
  0x68   : > { %484 = vrcp.f32 %v245_v10 }
  0x69   : > { %486 = vrcp.f32 %v259_v11 }
  0x6a   : > { %488 = vlog2.f32 %v245_v10 }
  0x6b   : > { %490 = vlog2.f32 %v259_v11 }
  0x72   : > { %v485_v13 = vpop.eup %484 }
  0x73   : > { %v252_v14 = vsub.f32 1.0, %v485_v13  ;;  %v487_v15 = vpop.eup %486 }
  0x74   : > { %v266_v18 = vsub.f32 1.0, %v487_v15  ;;  %v489_v28 = vpop.eup %488 }
  0x75   : > { %v253_v17 = vsel %vm251_vm0, %v485_v13, %v252_v14  ;;  %v248_v30 = vmul.f32 0.6931472, %v489_v28  ;;  %v491_v31 = vpop.eup %490 }
  0x76   : > { %v270_v19 = vmul.f32 %v253_v17, %v240_v12  ;;  %v267_v20 = vsel %vm265_vm1, %v487_v15, %v266_v18  ;;  %v276_v23 = vadd.f32 1.0, %v253_v17  ;;  %v262_v34 = vmul.f32 0.6931472, %v491_v31 }
  0x77   : > { %v271_v21 = vmul.f32 %v269_v16, %v267_v20  ;;  %v290_v24 = vadd.f32 1.0, %v267_v20  ;;  %v249_v32 = vsub.f32 %v246_v29, %v248_v30 }
  0x78   : > { %v263_v36 = vsub.f32 %v260_v33, %v262_v34 }
  0x79   : > { %v272_v22 = vadd.f32 %v271_v21, %v270_v19  ;;  %v274_v37 = vmul.f32 %v249_v32, %v240_v12  ;;  %v254_v43 = vsub.f32 %v249_v32, %v771_v0 }
  0x7a   : > { %v268_v47 = vsub.f32 %v263_v36, %v773_v1  ;;  %v288_v53 = vmul.f32 %v269_v16, %v263_v36 }
  0x7b   : > { %v415_v25 = vadd.f32 -0.05, %v272_v22  ;;  %v275_v48 = vsub.f32 0.0, %v274_v37 }
  0x7d   : > { %v277_v26 = vsub.f32 %v276_v23, %v415_v25  ;;  %v291_v27 = vsub.f32 %v290_v24, %v415_v25 }
  0x7f   : > { %492 = vrsqrt.f32 %v277_v26  ;;  %vm280_vm2 = vcmp.eq.f32.partialorder %v277_v26, inf  ;;  %v283_v38 = vand.u32 2147483648, %v277_v26  ;;  %vm282_vm3 = vcmp.eq.f32.partialorder %v277_v26, 0.0 }
  0x80   : > { %494 = vrsqrt.f32 %v291_v27  ;;  %vm294_vm4 = vcmp.eq.f32.partialorder %v291_v27, inf  ;;  %v297_v41 = vand.u32 2147483648, %v291_v27  ;;  %vm296_vm5 = vcmp.eq.f32.partialorder %v291_v27, 0.0 }
  0x89   : > { %v493_v35 = vpop.eup %492 }
  0x8a   : > { %v495_v39 = vpop.eup %494  ;;  %v279_v40 = vmul.f32 %v493_v35, %v277_v26 }
  0x8b   : > { %v293_v42 = vmul.f32 %v495_v39, %v291_v27 }
  0x8c   : > { %v281_v44 = vsel %vm280_vm2, %v277_v26, %v279_v40 }
  0x8d   : > { %v284_v45 = vsel %vm282_vm3, %v283_v38, %v281_v44  ;;  %v295_v46 = vsel %vm294_vm4, %v291_v27, %v293_v42 }
  0x8e   : > { %v285_v49 = vmul.f32 %v284_v45, %v269_v16  ;;  %v298_v50 = vsel %vm296_vm5, %v297_v41, %v295_v46 }
  0x8f   : > { %v299_v51 = vmul.f32 %v298_v50, %v240_v12 }
  0x90   : > { %v286_v52 = vmul.f32 %v285_v49, %v254_v43 }
  0x91   : > { %v300_v55 = vmul.f32 %v299_v51, %v268_v47 }
  0x92   : > { %v287_v54 = vsub.f32 %v275_v48, %v286_v52 }
  0x94   : > { %v289_v56 = vsub.f32 %v287_v54, %v288_v53 }
  0x96   : > { %v301_v57 = vsub.f32 %v289_v56, %v300_v55 }
  0x98   : > { %305 = vst [vmem:[%s232_s8] sm:$0xff] %v301_v57 }
  0x99 PF: > { %s18_s14 = sadd.s32 1, %s610_s14   ;;  %s817_s9 = smov %s594_s10 }
  0x9a   : > { %p15_p11 = scmp.ge.s32.totalorder %s18_s14, 4   ;;  %s818_s10 = smov %s598_s11 }
  0x9b   : > { %s819_s11 = smov %s683_s24  ;;  %s820_s12 = smov %s606_s13 }
  0x9c   : > { %s821_s13 = smov %s823_s16  ;;  %17 = sbr.rel (!%p15_p11) target bundleno = 6 (0x6), region = 85 }
  0xa3   :  { %325 = vsyncpa [#allocation3], 1 }
  0xa4   :  { %327 = vsyncpa [#allocation3 + $0x1], 1 }
  0xa5   :  { %328 = vsyncpa [#allocation5], 1 }
  0xa6   :  { %330 = vsyncpa [#allocation5 + $0x1], 1 }

</bundles_post_ra>
